<compile_context>
chip_gen: v7x
topology: tpu7x:2x2x1
jax: 0.10.0
libtpu: 0.0.40
codegen_flags: <defaults>
</compile_context>

<pallas_src>
import math
import functools

import jax
import jax.numpy as jnp
from jax.experimental import pallas as pl
from jax.experimental.pallas import tpu as pltpu


def ortho_norm(weight):
    # W_ortho = W @ inv(chol(W^T W + 1e-4 I))^T, via triangular solve (no explicit inverse).
    wtw = weight.T @ weight + 1e-4 * jnp.eye(weight.shape[1], dtype=weight.dtype)
    L = jnp.linalg.cholesky(wtw)
    # W @ (L^T)^{-1} == (L^{-1} @ W^T)^T
    return jax.scipy.linalg.solve_triangular(L, weight.T, lower=True).T


def _gcn_kernel(*refs, alpha, theta, residual):
    if residual:
        adj_ref, x_ref, h0_ref, w_ref, xres_ref, out_ref, acc_ref = refs
    else:
        adj_ref, x_ref, h0_ref, w_ref, out_ref, acc_ref = refs
        xres_ref = None

    k = pl.program_id(1)

    @pl.when(k == 0)
    def _():
        acc_ref[...] = jnp.zeros_like(acc_ref)

    # hi accumulation for this row tile: (tm, tk) @ (tk, F_pad) -> f32 (tm, F_pad)
    acc_ref[...] += jnp.dot(adj_ref[...], x_ref[...],
                            preferred_element_type=jnp.float32)

    @pl.when(k == pl.num_programs(1) - 1)
    def _():
        # Write `support` back into the accumulator scratch to keep only one
        # (tm, F_pad) temporary live besides sw/out (matters at large tm).
        acc_ref[...] = (1.0 - alpha) * acc_ref[...] + alpha * h0_ref[...]
        sw = jnp.dot(acc_ref[...], w_ref[...], preferred_element_type=jnp.float32)
        out = theta * sw + (1.0 - theta) * acc_ref[...]
        if residual:
            out = out + xres_ref[...]
        out_ref[...] = jnp.tanh(out)


def _round_up(x, m):
    return ((x + m - 1) // m) * m


def _choose_tile(n, target, sub):
    """Pick a tile size (multiple of `sub`) near `target`, plus the padded extent.

    Prefers an exact divisor of `n` within [target/2, target] (no padding); otherwise
    pads `n` up to a multiple of the target tile, so the grid never silently falls
    back to an N-wide block that could blow VMEM.
    """
    target = max(sub, (min(target, n) // sub) * sub)
    t = target
    lo = max(sub, target // 2)
    while t >= lo:
        if n % t == 0:
            return t, n
        t -= sub
    return target, _round_up(n, target)


def _vmem_limit_bytes():
    """Generation-aware VMEM budget: ~75% of physical per-core VMEM.

    v6e/v5e (128 MiB) -> ~96 MiB, v7x (64 MiB) -> 48 MiB; conservative fallback."""
    try:
        cap = int(pltpu.get_tpu_info().vmem_capacity_bytes)
    except Exception:
        cap = 64 * 1024 * 1024
    return min((cap * 3) // 4, 100 * 1024 * 1024)


def graph_convolution(x, adj, h0, weight, lamda, alpha, l, *,
                      residual=False, tm=512, tk=2048):
    """Pallas implementation of GraphConvolution.forward (variant=False).

    `adj` is used in whatever dtype it is passed in (f32 or bf16) -- cast it once
    at model setup rather than per layer (GCNII reuses adj across all layers).
    """
    N, F = x.shape
    assert adj.shape == (N, N) and h0.shape == (N, F) and weight.shape == (F, F)

    w_ortho = ortho_norm(weight.astype(jnp.float32))
    theta = math.log(lamda / l + 1.0)

    # Matmul dtype follows adj (the dominant HBM stream); all elementwise/tanh math
    # stays f32 (v5e VPU/EUP have no bf16). Accumulation is always f32 on the MXU.
    mm_dtype = adj.dtype
    itemsize = jnp.dtype(mm_dtype).itemsize
    # sublane packing: f32 -> 8, bf16 -> 16, int8/fp8 -> 32
    sub = max(8, 8 * (4 // max(1, itemsize)))

    # Lane-dense feature dim (full vregs, unmasked stores, full MXU output width).
    F_pad = _round_up(F, 128)

    # Row tiling: prefer >= 2 row tiles so the "parallel" axis can feed both
    # TensorCores on v7x; reduction tiling targets a multi-MiB adj tile.
    half = max(sub, ((N // 2) // sub) * sub) if N >= 2 * sub else N
    tm, n_pad_m = _choose_tile(N, min(tm, half), sub)
    tk, n_pad_k = _choose_tile(N, tk, sub)

    def pad2(a, rows, cols):
        if a.shape == (rows, cols):
            return a
        return jnp.pad(a, ((0, rows - a.shape[0]), (0, cols - a.shape[1])))

    # TODO(synk): for production, pre-pad adj (and pre-quantize to int8 on v5e/v6e or
    # fp8 on v7x with an epilogue rescale) once at model setup to avoid per-call pads.
    adj_p = pad2(adj, n_pad_m, n_pad_k)                       # no per-call cast
    x_mm = pad2(x.astype(mm_dtype) if x.dtype != mm_dtype else x, n_pad_k, F_pad)
    h0_p = pad2(h0.astype(jnp.float32), n_pad_m, F_pad)
    w_p = pad2(w_ortho.astype(jnp.float32), F_pad, F_pad)

    kernel = functools.partial(
        _gcn_kernel, alpha=float(alpha), theta=float(theta), residual=residual)

    in_specs = [
        pl.BlockSpec((tm, tk), lambda i, k: (i, k)),          # adj tile
        pl.BlockSpec((tk, F_pad), lambda i, k: (k, 0)),       # x tile (reduction operand)
        pl.BlockSpec((tm, F_pad), lambda i, k: (i, 0)),       # h0 row tile (resident across k)
        pl.BlockSpec((F_pad, F_pad), lambda i, k: (0, 0)),    # W_ortho (constant block)
    ]
    args = [adj_p, x_mm, h0_p, w_p]
    if residual:
        in_specs.append(pl.BlockSpec((tm, F_pad), lambda i, k: (i, 0)))
        args.append(pad2(x.astype(jnp.float32), n_pad_m, F_pad))

    grid_m = n_pad_m // tm
    grid_k = n_pad_k // tk

    cost = pl.CostEstimate(
        flops=2 * n_pad_m * n_pad_k * F_pad + 2 * n_pad_m * F_pad * F_pad,
        transcendentals=n_pad_m * F_pad,
        bytes_accessed=(n_pad_m * n_pad_k * itemsize            # adj read once
                        + grid_m * n_pad_k * F_pad * itemsize   # x re-streamed per row tile
                        + n_pad_m * F_pad * 4                   # h0
                        + F_pad * F_pad * 4                     # W
                        + n_pad_m * F_pad * 4                   # out
                        + (n_pad_m * F_pad * 4 if residual else 0)))

    out = pl.pallas_call(
        kernel,
        out_shape=jax.ShapeDtypeStruct((n_pad_m, F_pad), jnp.float32),
        grid_spec=pltpu.PrefetchScalarGridSpec(
            num_scalar_prefetch=0,
            grid=(grid_m, grid_k),                 # reduction axis last
            in_specs=in_specs,
            out_specs=pl.BlockSpec((tm, F_pad), lambda i, k: (i, 0)),
            scratch_shapes=[pltpu.VMEM((tm, F_pad), jnp.float32)],
        ),
        compiler_params=pltpu.CompilerParams(
            dimension_semantics=("parallel", "arbitrary"),
            vmem_limit_bytes=_vmem_limit_bytes(),
        ),
        cost_estimate=cost,
    )(*args)

    if (n_pad_m, F_pad) != (N, F):
        out = out[:N, :F]
    return out


def glorot_init(key, input_dim, output_dim):
    init_range = math.sqrt(6.0 / (input_dim + output_dim))
    return jax.random.uniform(
        key, (input_dim, output_dim), jnp.float32,
        minval=-init_range, maxval=init_range)


def _reference(x, adj, h0, weight, lamda, alpha, l, residual=False):
    w_ortho = ortho_norm(weight)
    theta = math.log(lamda / l + 1.0)
    hi = adj @ x
    support = (1.0 - alpha) * hi + alpha * h0
    out = theta * (support @ w_ortho) + (1.0 - theta) * support
    if residual:
        out = out + x
    return jnp.tanh(out)


if __name__ == "__main__":
    key = jax.random.PRNGKey(0)
    k_w, k_x, k_adj, k_h0 = jax.random.split(key, 4)

    N, F = 256, 64           # nodes x features; in_features == out_features
    lamda, alpha, l = 0.5, 0.1, 2

    weight = glorot_init(k_w, F, F)
    x = jax.random.normal(k_x, (N, F), jnp.float32)
    h0 = jax.random.normal(k_h0, (N, F), jnp.float32)
    # simple symmetric row-normalized-ish dense adjacency
    a = jax.random.uniform(k_adj, (N, N), jnp.float32)
    adj = (a + a.T) / (2.0 * N)

    # f32 adjacency path (both residual variants) -- tight tolerance vs reference.
    for residual in (False, True):
        out = graph_convolution(x, adj, h0, weight, lamda, alpha, l,
                                residual=residual)
        out = jax.block_until_ready(out)
        ref = _reference(x, adj, h0, weight, lamda, alpha, l, residual=residual)
        assert out.shape == (N, F)
        assert jnp.allclose(out, ref, atol=1e-5, rtol=1e-5), \
            f"mismatch vs reference (f32, residual={residual})"

    # bf16 adjacency path: adj cast ONCE outside the layer (hoisted per perf review),
    # exercised with and without the residual add -- loose tolerance.
    adj_bf16 = adj.astype(jnp.bfloat16)
    for residual in (False, True):
        out_bf16 = graph_convolution(x, adj_bf16, h0, weight, lamda, alpha, l,
                                      residual=residual)
        out_bf16 = jax.block_until_ready(out_bf16)
        ref = _reference(x, adj, h0, weight, lamda, alpha, l, residual=residual)
        assert jnp.allclose(out_bf16, ref, atol=2e-2, rtol=2e-2), \
            f"mismatch vs reference (bf16, residual={residual})"

    print("KERNEL_OK")
</pallas_src>

<mosaic_0001>
module attributes {stable_mosaic.version = 11 : i64} {
  func.func @_gcn_kernel(%arg0: i32, %arg1: i32, %arg2: memref<128x256xf32, #tpu.memory_space<vmem>>, %arg3: memref<256x128xf32, #tpu.memory_space<vmem>>, %arg4: memref<128x128xf32, #tpu.memory_space<vmem>>, %arg5: memref<128x128xf32, #tpu.memory_space<vmem>>, %arg6: memref<128x128xf32, #tpu.memory_space<vmem>>, %arg7: memref<128x128xf32, #tpu.memory_space<vmem>>) attributes {dimension_semantics = [#tpu.dimension_semantics<parallel>, #tpu.dimension_semantics<arbitrary>], iteration_bounds = array<i64: 2, 1>, scalar_prefetch = 0 : i64, scratch_operands = 1 : i64, tpu.core_type = #tpu.core_type<tc>, window_params = [{transform_indices = @transform_0, window_bounds = array<i64: 128, 256>}, {transform_indices = @transform_1, window_bounds = array<i64: 256, 128>}, {transform_indices = @transform_2, window_bounds = array<i64: 128, 128>}, {pipeline_mode = #tpu.pipeline_mode<synchronous>, transform_indices = @transform_3, window_bounds = array<i64: 128, 128>}, {transform_indices = @transform_4, window_bounds = array<i64: 128, 128>}]} {
    %c0_i32 = arith.constant 0 : i32
    %0 = arith.cmpi eq, %arg1, %c0_i32 : i32
    %1 = arith.extui %0 : i1 to i32
    %c0_i32_0 = arith.constant 0 : i32
    %2 = arith.cmpi ne, %1, %c0_i32_0 : i32
    scf.if %2 {
      %cst_10 = arith.constant 0.000000e+00 : f32
      %12 = vector.broadcast %cst_10 : f32 to vector<128x128xf32>
      %c0_11 = arith.constant 0 : index
      %c0_12 = arith.constant 0 : index
      %13 = vector.load %arg7[%c0_11, %c0_12] : memref<128x128xf32, #tpu.memory_space<vmem>>, vector<128x128xf32>
      tpu.vector_store %arg7[%c0_11, %c0_12], %12 {strides = array<i32>} : memref<128x128xf32, #tpu.memory_space<vmem>>, vector<128x128xf32>,
    } else {
    }
    %c0 = arith.constant 0 : index
    %c0_1 = arith.constant 0 : index
    %3 = vector.load %arg7[%c0, %c0_1] : memref<128x128xf32, #tpu.memory_space<vmem>>, vector<128x128xf32>
    %c0_2 = arith.constant 0 : index
    %c0_3 = arith.constant 0 : index
    %4 = vector.load %arg2[%c0_2, %c0_3] : memref<128x256xf32, #tpu.memory_space<vmem>>, vector<128x256xf32>
    %c0_4 = arith.constant 0 : index
    %c0_5 = arith.constant 0 : index
    %5 = vector.load %arg3[%c0_4, %c0_5] : memref<256x128xf32, #tpu.memory_space<vmem>>, vector<256x128xf32>
    %cst = arith.constant dense<0.000000e+00> : vector<128x128xf32>
    %6 = tpu.matmul %4, %5, %cst {dimension_numbers = #tpu.dot_dimension_numbers<[1], [0], [0], [1], [0, 0, 1, 1], [], []>} : vector<128x256xf32>, vector<256x128xf32>, vector<128x128xf32> -> vector<128x128xf32>
    %7 = arith.addf %3, %6 : vector<128x128xf32>
    %c0_6 = arith.constant 0 : index
    %c0_7 = arith.constant 0 : index
    %8 = vector.load %arg7[%c0_6, %c0_7] : memref<128x128xf32, #tpu.memory_space<vmem>>, vector<128x128xf32>
    tpu.vector_store %arg7[%c0_6, %c0_7], %7 {strides = array<i32>} : memref<128x128xf32, #tpu.memory_space<vmem>>, vector<128x128xf32>,
    %c0_i32_8 = arith.constant 0 : i32
    %9 = arith.cmpi eq, %arg1, %c0_i32_8 : i32
    %10 = arith.extui %9 : i1 to i32
    %c0_i32_9 = arith.constant 0 : i32
    %11 = arith.cmpi ne, %10, %c0_i32_9 : i32
    scf.if %11 {
      %c0_10 = arith.constant 0 : index
      %c0_11 = arith.constant 0 : index
      %12 = vector.load %arg7[%c0_10, %c0_11] : memref<128x128xf32, #tpu.memory_space<vmem>>, vector<128x128xf32>
      %cst_12 = arith.constant 0.899999976 : f32
      %13 = vector.broadcast %cst_12 : f32 to vector<128x128xf32>
      %14 = arith.mulf %13, %12 : vector<128x128xf32>
      %c0_13 = arith.constant 0 : index
      %c0_14 = arith.constant 0 : index
      %15 = vector.load %arg4[%c0_13, %c0_14] : memref<128x128xf32, #tpu.memory_space<vmem>>, vector<128x128xf32>
      %cst_15 = arith.constant 1.000000e-01 : f32
      %16 = vector.broadcast %cst_15 : f32 to vector<128x128xf32>
      %17 = arith.mulf %16, %15 : vector<128x128xf32>
      %18 = arith.addf %14, %17 : vector<128x128xf32>
      %c0_16 = arith.constant 0 : index
      %c0_17 = arith.constant 0 : index
      %19 = vector.load %arg7[%c0_16, %c0_17] : memref<128x128xf32, #tpu.memory_space<vmem>>, vector<128x128xf32>
      tpu.vector_store %arg7[%c0_16, %c0_17], %18 {strides = array<i32>} : memref<128x128xf32, #tpu.memory_space<vmem>>, vector<128x128xf32>,
      %c0_18 = arith.constant 0 : index
      %c0_19 = arith.constant 0 : index
      %20 = vector.load %arg7[%c0_18, %c0_19] : memref<128x128xf32, #tpu.memory_space<vmem>>, vector<128x128xf32>
      %c0_20 = arith.constant 0 : index
      %c0_21 = arith.constant 0 : index
      %21 = vector.load %arg5[%c0_20, %c0_21] : memref<128x128xf32, #tpu.memory_space<vmem>>, vector<128x128xf32>
      %cst_22 = arith.constant dense<0.000000e+00> : vector<128x128xf32>
      %22 = tpu.matmul %20, %21, %cst_22 {dimension_numbers = #tpu.dot_dimension_numbers<[1], [0], [0], [1], [0, 0, 1, 1], [], []>} : vector<128x128xf32>, vector<128x128xf32>, vector<128x128xf32> -> vector<128x128xf32>
      %cst_23 = arith.constant 0.223143548 : f32
      %23 = vector.broadcast %cst_23 : f32 to vector<128x128xf32>
      %24 = arith.mulf %23, %22 : vector<128x128xf32>
      %c0_24 = arith.constant 0 : index
      %c0_25 = arith.constant 0 : index
      %25 = vector.load %arg7[%c0_24, %c0_25] : memref<128x128xf32, #tpu.memory_space<vmem>>, vector<128x128xf32>
      %cst_26 = arith.constant 0.776856422 : f32
      %26 = vector.broadcast %cst_26 : f32 to vector<128x128xf32>
      %27 = arith.mulf %26, %25 : vector<128x128xf32>
      %28 = arith.addf %24, %27 : vector<128x128xf32>
      %29 = math.tanh %28 : vector<128x128xf32>
      %c0_27 = arith.constant 0 : index
      %c0_28 = arith.constant 0 : index
      %30 = vector.load %arg6[%c0_27, %c0_28] : memref<128x128xf32, #tpu.memory_space<vmem>>, vector<128x128xf32>
      tpu.vector_store %arg6[%c0_27, %c0_28], %29 {strides = array<i32>} : memref<128x128xf32, #tpu.memory_space<vmem>>, vector<128x128xf32>,
    } else {
    }
    return
  }
  func.func @transform_0(%arg0: i32, %arg1: i32) -> (i32, i32) {
    %c0_i32 = arith.constant 0 : i32
    return %arg0, %arg1 : i32, i32
  }
  func.func @transform_1(%arg0: i32, %arg1: i32) -> (i32, i32) {
    %c0_i32 = arith.constant 0 : i32
    %c0_i32_0 = arith.constant 0 : i32
    return %arg1, %c0_i32 : i32, i32
  }
  func.func @transform_2(%arg0: i32, %arg1: i32) -> (i32, i32) {
    %c0_i32 = arith.constant 0 : i32
    %c0_i32_0 = arith.constant 0 : i32
    return %arg0, %c0_i32 : i32, i32
  }
  func.func @transform_3(%arg0: i32, %arg1: i32) -> (i32, i32) {
    %c0_i32 = arith.constant 0 : i32
    %c0_i32_0 = arith.constant 0 : i32
    %c0_i32_1 = arith.constant 0 : i32
    return %c0_i32, %c0_i32_0 : i32, i32
  }
  func.func @transform_4(%arg0: i32, %arg1: i32) -> (i32, i32) {
    %c0_i32 = arith.constant 0 : i32
    %c0_i32_0 = arith.constant 0 : i32
    return %arg0, %c0_i32 : i32, i32
  }
}

</mosaic_0001>

<bundles_post_ra>
// kernel: tpu_custom_call.1
= control target key start
LH: loop header
LB: loop body
LE: loop exit
PB: predicated region body
PF: predicated region fallthrough
CT: control target
= control target key end

     0   :  { %s2153_s0 = inlined_call_operand.hbm [shape: f32[256,256], index: 0, kind: input, shape index: {}]   ;;  %s2154_s1 = inlined_call_operand.hbm [shape: f32[256,128], index: 1, kind: input, shape index: {}]   ;;  %s2155_s2 = inlined_call_operand.hbm [shape: f32[256,128], index: 2, kind: input, shape index: {}]   ;;  %s2156_s3 = inlined_call_operand.hbm [shape: f32[128,128], index: 3, kind: input, shape index: {}]   ;;  %s2157_s4 = inlined_call_operand.hbm [shape: f32[256,128], index: 4, kind: output, shape index: {}]  }
   0x1   :  { %2173 = sst [smem:[#allocation19_spill]] %s2153_s0 }
   0x2   :  { %2174 = sst [smem:[#allocation20_spill]] %s2154_s1 }
   0x3   :  { %9 = vsyncpa [#allocation4], 0 }
   0x4   :  { %11 = vsyncpa [#allocation4 + $0x1], 0 }
   0x5   :  { %12 = vsyncpa [#allocation7], 0 }
   0x6   :  { %13 = vsyncpa [#allocation5], 0 }
   0x7   :  { %15 = vsyncpa [#allocation5 + $0x1], 0  ;;  %s1718_s15 = smov 0   ;;  %s1720_s16 = smov 0  }
   0x8   :  { %s1722_s17 = smov 0   ;;  %s1724_s18 = smov 0  }
   0x9   :  { %s1726_s19 = smov 0   ;;  %s1728_s20 = smov 0  }
   0xa LB: > { %2175 = sst [smem:[#allocation16_spill]] %s1680_s20  ;;  %s1749_s21 = sadd.s32 4294967295, %s1680_s20   ;;  %s1680_s20 = sphi %s1728_s20, %s21_s20   ;;  %s1676_s19 = sphi %s1726_s19, %s2211_s19   ;;  %s1672_s18 = sphi %s1724_s18, %s2210_s18   ;;  %s1668_s17 = sphi %s1722_s17, %s2209_s17   ;;  %s1664_s16 = sphi %s1720_s16, %s2208_s16   ;;  %s1660_s15 = sphi %s1718_s15, %s2207_s15  }
   0xb   : > { %s1085_s22 = sadd.s32 4294967294, %s1680_s20   ;;  %p55_p0 = scmp.ne.s32.totalorder %s1664_s16, %s1660_s15 }
   0xc   : > { %p2158_p1 = scmp.eq.s32.totalorder %s1749_s21, 0  ;;  %p158_p3 = scmp.eq.s32.totalorder %s1085_s22, 1 }
   0xd   : > { %p1086_p5 = scmp.ge.s32.totalorder %s1680_s20, 1  ;;  %p165_p7 = scmp.lt.s32.totalorder %s1680_s20, 3 }
   0xe   : > { %p1758_p4 = por %p2158_p1, %p55_p0  ;;  %p1763_p6 = por %p158_p3, %p55_p0 }
   0xf   : > { %p1768_p8 = pnand %p1086_p5, %p165_p7  ;;  %s1682_s26 = smov [#allocation6]  }
  0x10   : > { %s2176_s23 = scalar_select %p1758_p4, 1, 0 }
  0x11   : > { %s2177_s24 = scalar_select %p1763_p6, 1, 0 }
  0x12   : > { %s2178_s25 = scalar_select %p1768_p8, 1, 0 }
  0x13   : > { %s180_s27 = sshll.u32 %s1682_s26, 4  ;;  %p1358_p9 = pneg %p1768_p8  ;;  %s181_s27 = int_to_ptr.vmem [resolvable:$true] %s180_s27 }
  0x14   : > { %s33_s29 = sadd.s32 1, %s1676_s19  ;;  %s2180_s1 = sld [smem:[#allocation20_spill]] }
  0x15   : > { %p1777_p11 = pnand %p1358_p9, %p2158_p1 }
  0x17   : > { %p2165_p13 = pneg %p1777_p11 }
  0x1a   : > { %s1470_s6 = scalar_lea.hbm %s2180_s1, 4096 }
  0x1b   : > { %p1471_p12 = scmp.ne.s32.totalorder %s2180_s1, %s1470_s6  ;;  %p1477_p5 = scmp.lt.u32.totalorder %s1470_s6, %s2180_s1 }
  0x1d   : > { %p1473_p0 = pnand %p2165_p13, %p1471_p12 }
  0x1f   : > { %p1474_p3 = pneg %p1473_p0 }
  0x21   : > { %p1479_p7 = pnand %p1477_p5, %p1474_p3 }
  0x23   : > { %1482 = shalt.err (!%p1479_p7)
}
  0x24   : > { %s1483_s11 = scalar_lea.vmem %s181_s27, 4096  ;;  %p1491_p2 = scmp.lt.s32.totalorder %s181_s27, %s181_s27 }
  0x25   : > { %p1484_p9 = scmp.ne.s32.totalorder %s181_s27, %s1483_s11  ;;  %p1492_p6 = scmp.lt.s32.totalorder %s1483_s11, %s1483_s11 }
  0x27   : > { %p1486_p10 = pnand %p1484_p9, %p2165_p13  ;;  %p1493_p4 = por %p1492_p6, %p1491_p2 }
  0x29   : > { %p1487_p1 = pneg %p1486_p10 }
  0x2b   : > { %p1494_p8 = pnand %p1493_p4, %p1487_p1 }
  0x2d   : > { %1497 = shalt.err (!%p1494_p8)
}
  0x2e   : > { %s2161_s12 = smov 128   ;;  %s2163_s13 = smov 8  }
  0x2f   : > { %1361 = dma.hbm_to_vmem [thread:$0]  (!%p1777_p11), %s2180_s1, 4096, %s181_s27, [#allocation7], %s2161_s12, %s2161_s12, %s2163_s13  }
  0x30   : > { %p35_p1 = scmp.ge.s32.totalorder %s33_s29, 2  ;;  %s42_s26 = sadd.s32 1, %s1668_s17 }
  0x31   : > { %p49_p2 = scmp.ne.s32.totalorder %s1668_s17, %s1664_s16  ;;  %p50_p4 = scmp.eq.s32.totalorder %s1680_s20, 0 }
  0x32   : > { %s2213_s29 = smov (%p35_p1, %s33_s29), 0  ;;  %p2183_p8 = scmp.eq.s32.totalorder %s1749_s21, 1 }
  0x33   : > { %2181 = sst [smem:[#allocation17_spill]] %s2213_s29  ;;  %p1813_p6 = por %p50_p4, %p49_p2 }
  0x34   : > { %p1819_p10 = por %p2183_p8, %p49_p2  ;;  %s37_s6 = ssub.s32 %s1676_s19, %s2213_s29 }
  0x35   : > { %p1378_p12 = scmp.lt.s32.totalorder %s1680_s20, 2  ;;  %p40_p0 = scmp.eq.s32.totalorder %s37_s6, 0 }
  0x36   : > { %s2184_s5 = scalar_select %p1819_p10, 1, 0 }
  0x37   : > { %s207_s27 = sand.u32 1, %s1680_s20   ;;  %s209_s7 = sand.u32 1, %s1668_s17  }
  0x38   : > { %s1829_s8 = scalar_select %p40_p0, %s1668_s17, %s42_s26  }
  0x39   : > { %s1090_s9 = sshll.u32 %s209_s7, 8  ;;  %s1109_s10 = sshll.u32 %s1676_s19, 12 }
  0x3a   : > { %2185 = sst [smem:[#allocation18_spill]] %s1829_s8  ;;  %s2186_s0 = sld [smem:[#allocation19_spill]] }
  0x3b   : > { %s211_s12 = scalar_lea.vmem [#allocation3], %s1090_s9  ;;  %p1841_p3 = pnand %p1378_p12, %p1813_p6 }
  0x3c   : > { %s221_s13 = sshll.u32 %s211_s12, 4  ;;  %s1847_s26 = scalar_lea.sflag [#allocation4], %s207_s27  ;;  %s1845_s13 = int_to_ptr.vmem [resolvable:$true] %s221_s13 }
  0x3d   : > { %s2187_s6 = scalar_select %p1841_p3, 1, 0 }
  0x3e   : > { %p2170_p7 = pneg %p1841_p3 }
  0x40   : > { %s1837_s22 = scalar_lea.hbm %s2186_s0, %s1109_s10  ;;  %s1503_s9 = scalar_lea.hbm %s2186_s0, 8192 }
  0x41   : > { %s1498_s11 = scalar_lea.hbm %s1837_s22, 4096  ;;  %p1504_p2 = scmp.lt.u32.totalorder %s1837_s22, %s2186_s0 }
  0x42   : > { %p1499_p5 = scmp.ne.s32.totalorder %s1837_s22, %s1498_s11  ;;  %p1505_p4 = scmp.lt.u32.totalorder %s1503_s9, %s1498_s11 }
  0x43   : > { %p1507_p8 = scmp.lt.u32.totalorder %s1498_s11, %s1837_s22 }
  0x44   : > { %p1501_p9 = pnand %p2170_p7, %p1499_p5  ;;  %p1506_p6 = por %p1505_p4, %p1504_p2 }
  0x46   : > { %p1502_p1 = pneg %p1501_p9  ;;  %p1508_p12 = por %p1507_p8, %p1506_p6 }
  0x48   : > { %p1509_p0 = pnand %p1508_p12, %p1502_p1 }
  0x4a   : > { %1512 = shalt.err (!%p1509_p0)
}
  0x4b   : > { %s1513_s27 = scalar_lea.vmem %s1845_s13, 4096  ;;  %s1685_s12 = smov [#allocation3]  }
  0x4c   : > { %p1514_p5 = scmp.ne.s32.totalorder %s1845_s13, %s1513_s27  ;;  %s1518_s30 = sshll.u32 %s1685_s12, 4  ;;  %s1519_s30 = int_to_ptr.vmem [resolvable:$false] %s1518_s30 }
  0x4d   : > { %s1520_s10 = scalar_lea.vmem %s1519_s30, 8192  ;;  %p1521_p10 = scmp.lt.s32.totalorder %s1845_s13, %s1519_s30 }
  0x4e   : > { %p1516_p9 = pnand %p1514_p5, %p2170_p7  ;;  %p1522_p2 = scmp.lt.s32.totalorder %s1520_s10, %s1513_s27 }
  0x50   : > { %p1517_p13 = pneg %p1516_p9  ;;  %p1523_p4 = por %p1522_p2, %p1521_p10 }
  0x52   : > { %p1524_p6 = pnand %p1523_p4, %p1517_p13 }
  0x54   : > { %1527 = shalt.err (!%p1524_p6)
}
  0x55   : > { %s1686_s11 = smov 256   ;;  %s1687_s9 = smov 16  }
  0x56   : > { %1368 = dma.hbm_to_vmem [thread:$0]  (!%p1841_p3), %s1837_s22, 4096, %s1845_s13, %s1847_s26, %s1686_s11, %s1686_s11, %s1687_s9  }
  0x57   : > { %s1094_s14 = sshll.u32 %s209_s7, 7  ;;  %s1688_s12 = smov [#allocation9]  }
  0x58   : > { %s193_s0 = sshll.u32 %s1688_s12, 4  ;;  %s235_s1 = scalar_lea.vmem [#allocation8], %s1094_s14  ;;  %s194_s0 = int_to_ptr.vmem [resolvable:$true] %s193_s0 }
  0x59   : > { %s242_s30 = sshll.u32 %s235_s1, 4  ;;  %s1528_s29 = scalar_lea.hbm %s2156_s3, 2048  ;;  %s1901_s30 = int_to_ptr.vmem [resolvable:$true] %s242_s30 }
  0x5a   : > { %p1529_p13 = scmp.ne.s32.totalorder %s2156_s3, %s1528_s29  ;;  %p2188_p10 = pneg %p1777_p11 }
  0x5b   : > { %p1535_p12 = scmp.lt.u32.totalorder %s1528_s29, %s2156_s3 }
  0x5c   : > { %p1531_p1 = pnand %p1529_p13, %p2188_p10 }
  0x5e   : > { %p1532_p8 = pneg %p1531_p1 }
  0x60   : > { %p1537_p0 = pnand %p1535_p12, %p1532_p8 }
  0x62   : > { %1540 = shalt.err (!%p1537_p0)
}
  0x63   : > { %s1541_s1 = scalar_lea.vmem %s194_s0, 2048  ;;  %p2189_p9 = pmov %p2188_p10 }
  0x64   : > { %p1542_p5 = scmp.ne.s32.totalorder %s194_s0, %s1541_s1  ;;  %p1549_p6 = scmp.lt.s32.totalorder %s194_s0, %s194_s0 }
  0x65   : > { %p1550_p7 = scmp.lt.s32.totalorder %s1541_s1, %s1541_s1 }
  0x66   : > { %p1544_p2 = pnand %p1542_p5, %p2189_p9 }
  0x67   : > { %p1551_p3 = por %p1550_p7, %p1549_p6 }
  0x68   : > { %p1545_p4 = pneg %p1544_p2 }
  0x6a   : > { %p1552_p10 = pnand %p1551_p3, %p1545_p4 }
  0x6c   : > { %1555 = shalt.err (!%p1552_p10)
}
  0x6d   : > { %s2190_s20 = smov 8   ;;  %s2191_s7 = smov 128  }
  0x6e   : > { %1364 = dma.hbm_to_vmem [thread:$0]  (!%p1777_p11), %s2156_s3, 2048, %s194_s0, [#allocation7], %s2191_s7, %s2191_s7, %s2190_s20  }
  0x6f   : > { %s1110_s11 = sshll.u32 %s1676_s19, 11  ;;  %p2192_p7 = scmp.ne.s32.totalorder %s2187_s6, 0 }
  0x70   : > { %s1906_s12 = scalar_lea.hbm %s2155_s2, %s1110_s11  ;;  %s1561_s10 = scalar_lea.hbm %s2155_s2, 4096 }
  0x71   : > { %s1556_s28 = scalar_lea.hbm %s1906_s12, 2048  ;;  %p2193_p13 = pneg %p2192_p7 }
  0x72   : > { %p1557_p3 = scmp.ne.s32.totalorder %s1906_s12, %s1556_s28  ;;  %p1562_p11 = scmp.lt.u32.totalorder %s1906_s12, %s2155_s2 }
  0x73   : > { %p1563_p12 = scmp.lt.u32.totalorder %s1561_s10, %s1556_s28  ;;  %p1565_p5 = scmp.lt.u32.totalorder %s1556_s28, %s1906_s12 }
  0x74   : > { %p1559_p1 = pnand %p1557_p3, %p2193_p13 }
  0x75   : > { %p1564_p0 = por %p1563_p12, %p1562_p11 }
  0x76   : > { %p1560_p8 = pneg %p1559_p1 }
  0x77   : > { %p1566_p9 = por %p1565_p5, %p1564_p0 }
  0x79   : > { %p1567_p2 = pnand %p1566_p9, %p1560_p8 }
  0x7b   : > { %1570 = shalt.err (!%p1567_p2)
}
  0x7c   : > { %s1571_s1 = scalar_lea.vmem %s1901_s30, 2048  ;;  %p2194_p6 = pmov %p2193_p13 }
  0x7d   : > { %p1572_p4 = scmp.ne.s32.totalorder %s1901_s30, %s1571_s1  ;;  %s1689_s29 = smov [#allocation8]  }
  0x7e   : > { %s1576_s8 = sshll.u32 %s1689_s29, 4  ;;  %s1577_s8 = int_to_ptr.vmem [resolvable:$false] %s1576_s8 }
  0x7f   : > { %p1574_p10 = pnand %p1572_p4, %p2194_p6  ;;  %s1578_s11 = scalar_lea.vmem %s1577_s8, 4096 }
  0x80   : > { %p1579_p13 = scmp.lt.s32.totalorder %s1901_s30, %s1577_s8  ;;  %p1580_p1 = scmp.lt.s32.totalorder %s1578_s11, %s1571_s1 }
  0x81   : > { %p1575_p3 = pneg %p1574_p10 }
  0x82   : > { %p1581_p11 = por %p1580_p1, %p1579_p13 }
  0x84   : > { %p1582_p12 = pnand %p1581_p11, %p1575_p3 }
  0x86   : > { %1585 = shalt.err (!%p1582_p12)
}
  0x87   : > { %1371 = dma.hbm_to_vmem [thread:$0]  (!%p2192_p7), %s1906_s12, 2048, %s1901_s30, %s1847_s26, %s2191_s7, %s2191_s7, %s2190_s20  }
  0x88   : > { %p2195_p8 = scmp.ne.s32.totalorder %s2178_s25, 0 }
  0x89   : > { %s256_s9 = sand.u32 (!%p2195_p8), 1, %s1749_s21   ;;  %s1939_s14 = sand.u32 (!%p2195_p8), 1, %s1664_s16  }
  0x8a   : > { %254 = sbr.rel (%p2195_p8) target bundleno = 712 (0x2c8), region = 36  ;;  %s1098_s28 = sshll.u32 (!%p2195_p8), %s1939_s14, 8 }
  0x8b   : > { %s257_s27 = scalar_lea.sflag (!%p2195_p8), [#allocation4], %s256_s9  ;;  %s1942_s6 = scalar_lea.vmem (!%p2195_p8), [#allocation3], %s1098_s28 }
  0x8c   : > { %p2196_p0 = scmp.ne.s32.totalorder (!%p2195_p8), %s2176_s23, 0 }
  0x91   : > { %1639 = dma.done.wait (%p2196_p0), %s257_s27, 4096  }
  0x92   : > { %1641 = vsyncadd (%p2196_p0), %s257_s27, 4294963200  ;;  %p2197_p7 = scmp.eq.s32.totalorder %s1749_s21, 0 }
  0x94   : > { %1643 = dma.done.wait (%p2197_p7), [#allocation7], 4096   ;;  %p2198_p5 = pmov %p2197_p7 }
  0x95   : > { %s1100_s25 = sshll.u32 %s1939_s14, 7 }
  0x96   : > { %1645 = vsyncadd (%p2198_p5), [#allocation7], 4294963200  ;;  %s1955_s26 = scalar_lea.vmem [#allocation8], %s1100_s25 }
  0x97   : > { %1647 = dma.done.wait (%p2196_p0), %s257_s27, 2048  }
  0x98   : > { %1649 = vsyncadd (%p2196_p0), %s257_s27, 4294965248  ;;  %p2199_p9 = pmov %p2198_p5 }
  0x99   : > { %p2200_p2 = pmov %p2198_p5 }
  0x9a   : > { %1651 = dma.done.wait (%p2199_p9), [#allocation7], 2048  }
  0x9b   : > { %1653 = vsyncadd (%p2200_p2), [#allocation7], 4294965248  ;;  %v396_v0 = vld [vmem:[#allocation6 + $0x80] sm:$0xff]  ;;  %v397_v1 = vld [vmem:[#allocation6 + $0x88] sm:$0xff]  ;;  %s2067_s21 = scalar_lea.vmem [#allocation10], %s1100_s25  ;;  %s1111_s23 = sshll.u32 %s1672_s18, 11 }
  0x9c   : > { %v380_v2 = vld [vmem:[#allocation6] sm:$0xff]  ;;  %v1280_v3 = vpack.c.bf16 %v397_v1, %v396_v0  ;;  %v381_v4 = vld [vmem:[#allocation6 + $0x8] sm:$0xff]  ;;  %v398_v5 = vld [vmem:[#allocation6 + $0x90] sm:$0xff]  ;;  %s959_s30 = sshll.u32 %s2067_s21, 4  ;;  %s2100_s12 = scalar_lea.hbm %s2157_s4, %s1111_s23  ;;  %s2102_s30 = int_to_ptr.vmem [resolvable:$true] %s959_s30 }
  0x9d   : > { %v399_v6 = vld [vmem:[#allocation6 + $0x98] sm:$0xff]  ;;  %v1282_v7 = vpack.c.bf16 %v381_v4, %v380_v2  ;;  %v382_v9 = vld [vmem:[#allocation6 + $0x10] sm:$0xff]  ;;  %v400_v11 = vld [vmem:[#allocation6 + $0xa0] sm:$0xff]  ;;  %s946_s0 = scalar_lea.sflag [#allocation5], %s1939_s14  ;;  %s1586_s10 = scalar_lea.vmem %s2102_s30, 2048 }
  0x9e   : > { %v1284_v8 = vpack.c.bf16 %v399_v6, %v398_v5  ;;  %v383_v10 = vld [vmem:[#allocation6 + $0x18] sm:$0xff]  ;;  %1281 = vmatprep.subr.bf16.mxu0 %v1280_v3  ;;  %v401_v12 = vld [vmem:[#allocation6 + $0xa8] sm:$0xff]  ;;  %v384_v15 = vld [vmem:[#allocation6 + $0x20] sm:$0xff]  ;;  %p1587_p4 = scmp.ne.s32.totalorder %s2102_s30, %s1586_s10  ;;  %p2201_p6 = scmp.ne.s32.totalorder %s2184_s5, 0 }
  0x9f   : > { %1283 = vmatpush3.bf16.msra.mxu0 %v1282_v7  ;;  %v1286_v13 = vpack.c.bf16 %v383_v10, %v382_v9  ;;  %v1288_v14 = vpack.c.bf16 %v401_v12, %v400_v11  ;;  %v385_v16 = vld [vmem:[#allocation6 + $0x28] sm:$0xff]  ;;  %v402_v17 = vld [vmem:[#allocation6 + $0xb0] sm:$0xff]  ;;  %v403_v18 = vld [vmem:[#allocation6 + $0xb8] sm:$0xff]  ;;  %s1690_s18 = smov [#allocation10]  }
  0xa0   : > { %1285 = vmatprep.subr.bf16.mxu0 %v1284_v8  ;;  %v1290_v19 = vpack.c.bf16 %v385_v16, %v384_v15  ;;  %v1292_v20 = vpack.c.bf16 %v403_v18, %v402_v17  ;;  %v386_v21 = vld [vmem:[#allocation6 + $0x30] sm:$0xff]  ;;  %v387_v22 = vld [vmem:[#allocation6 + $0x38] sm:$0xff]  ;;  %v404_v23 = vld [vmem:[#allocation6 + $0xc0] sm:$0xff]  ;;  %p1588_p10 = pnand %p1587_p4, %p2201_p6  ;;  %s1590_s13 = sshll.u32 %s1690_s18, 4  ;;  %s1591_s13 = int_to_ptr.vmem [resolvable:$false] %s1590_s13 }
  0xa1   : > { %v405_v24 = vld [vmem:[#allocation6 + $0xc8] sm:$0xff]  ;;  %v1294_v26 = vpack.c.bf16 %v387_v22, %v386_v21  ;;  %v388_v28 = vld [vmem:[#allocation6 + $0x40] sm:$0xff]  ;;  %v406_v30 = vld [vmem:[#allocation6 + $0xd0] sm:$0xff]  ;;  %s1592_s22 = scalar_lea.vmem %s1591_s13, 4096  ;;  %p1593_p13 = scmp.lt.s32.totalorder %s2102_s30, %s1591_s13 }
  0xa2   : > { %v349_v25 = vld [vmem:[%s1942_s6 + $0x8] sm:$0xff]  ;;  %v1296_v27 = vpack.c.bf16 %v405_v24, %v404_v23  ;;  %v407_v31 = vld [vmem:[#allocation6 + $0xd8] sm:$0xff]  ;;  %v390_v34 = vld [vmem:[#allocation6 + $0x50] sm:$0xff]  ;;  %p1589_p3 = pneg %p1588_p10  ;;  %p1594_p1 = scmp.lt.s32.totalorder %s1592_s22, %s1586_s10 }
  0xa3   : > { %1287 = vmatpush3.bf16.msra.mxu0 %v1286_v13  ;;  %476 = vmatprep.mubr.f32.mxu0 %v349_v25  ;;  %v389_v29 = vld [vmem:[#allocation6 + $0x48] sm:$0xff]  ;;  %v1300_v33 = vpack.c.bf16 %v407_v31, %v406_v30  ;;  %v391_v35 = vld [vmem:[#allocation6 + $0x58] sm:$0xff]  ;;  %v408_v36 = vld [vmem:[#allocation6 + $0xe0] sm:$0xff] }
  0xa4   : > { %1289 = vmatprep.subr.bf16.mxu0 %v1288_v14  ;;  %v1298_v32 = vpack.c.bf16 %v389_v29, %v388_v28  ;;  %v409_v37 = vld [vmem:[#allocation6 + $0xe8] sm:$0xff]  ;;  %v1302_v38 = vpack.c.bf16 %v391_v35, %v390_v34  ;;  %v392_v39 = vld [vmem:[#allocation6 + $0x60] sm:$0xff]  ;;  %v410_v42 = vld [vmem:[#allocation6 + $0xf0] sm:$0xff]  ;;  %p1595_p11 = por %p1594_p1, %p1593_p13 }
  0xa5   : > { %v393_v40 = vld [vmem:[#allocation6 + $0x68] sm:$0xff]  ;;  %v1304_v41 = vpack.c.bf16 %v409_v37, %v408_v36  ;;  %v704_v43 = vld [vmem:[#allocation9] sm:$0xff]  ;;  %v411_v45 = vld [vmem:[#allocation6 + $0xf8] sm:$0xff] }
  0xa6   : > { %v705_v44 = vld [vmem:[#allocation9 + $0x8] sm:$0xff]  ;;  %v706_v47 = vld [vmem:[#allocation9 + $0x10] sm:$0xff]  ;;  %v707_v48 = vld [vmem:[#allocation9 + $0x18] sm:$0xff]  ;;  %v1306_v52 = vpack.c.bf16 %v393_v40, %v392_v39  ;;  %v1308_v53 = vpack.c.bf16 %v411_v45, %v410_v42  ;;  %p1596_p12 = pnand %p1595_p11, %p1589_p3 }
  0xa7   : > { %1291 = vmatpush3.bf16.msra.mxu0 %v1290_v19  ;;  %v1312_v46 = vpack.c.bf16 %v705_v44, %v704_v43  ;;  %v1316_v49 = vpack.c.bf16 %v707_v48, %v706_v47  ;;  %v708_v50 = vld [vmem:[#allocation9 + $0x20] sm:$0xff]  ;;  %v709_v51 = vld [vmem:[#allocation9 + $0x28] sm:$0xff]  ;;  %v394_v54 = vld [vmem:[#allocation6 + $0x70] sm:$0xff] }
  0xa8   : > { %1293 = vmatprep.subr.bf16.mxu0 %v1292_v20  ;;  %v395_v55 = vld [vmem:[#allocation6 + $0x78] sm:$0xff]  ;;  %v1320_v56 = vpack.c.bf16 %v709_v51, %v708_v50  ;;  %v710_v57 = vld [vmem:[#allocation9 + $0x30] sm:$0xff]  ;;  %v712_v61 = vld [vmem:[#allocation9 + $0x40] sm:$0xff] }
  0xa9   : > { %1313 = vmatprep.subr.bf16.mxu1 %v1312_v46  ;;  %v711_v58 = vld [vmem:[#allocation9 + $0x38] sm:$0xff]  ;;  %v1310_v59 = vpack.c.bf16 %v395_v55, %v394_v54  ;;  %v713_v62 = vld [vmem:[#allocation9 + $0x48] sm:$0xff]  ;;  %v348_v63 = vld [vmem:[%s1942_s6] sm:$0xff] }
  0xaa   : > { %1315 = vmatpush3.bf16.msra.mxu1 %v1312_v46  ;;  %v1324_v60 = vpack.c.bf16 %v711_v58, %v710_v57  ;;  %v351_v0 = vld [vmem:[%s1942_s6 + $0x18] sm:$0xff]  ;;  %v1328_v1 = vpack.c.bf16 %v713_v62, %v712_v61  ;;  %v350_v2 = vld [vmem:[%s1942_s6 + $0x10] sm:$0xff]  ;;  %v353_v3 = vld [vmem:[%s1942_s6 + $0x28] sm:$0xff] }
  0xab   : > { %1295 = vmatpush3.bf16.msra.mxu0 %v1294_v26  ;;  %1317 = vmatprep.subr.bf16.mxu1 %v1316_v49  ;;  %v352_v4 = vld [vmem:[%s1942_s6 + $0x20] sm:$0xff]  ;;  %v355_v5 = vld [vmem:[%s1942_s6 + $0x38] sm:$0xff]  ;;  %v354_v6 = vld [vmem:[%s1942_s6 + $0x30] sm:$0xff] }
  0xac   : > { %1297 = vmatprep.subr.bf16.mxu0 %v1296_v27  ;;  %v357_v7 = vld [vmem:[%s1942_s6 + $0x48] sm:$0xff]  ;;  %v356_v8 = vld [vmem:[%s1942_s6 + $0x40] sm:$0xff]  ;;  %v359_v9 = vld [vmem:[%s1942_s6 + $0x58] sm:$0xff] }
  0xad   : > { %v358_v10 = vld [vmem:[%s1942_s6 + $0x50] sm:$0xff]  ;;  %v361_v11 = vld [vmem:[%s1942_s6 + $0x68] sm:$0xff]  ;;  %v360_v12 = vld [vmem:[%s1942_s6 + $0x60] sm:$0xff] }
  0xae   : > { %1319 = vmatpush3.bf16.msra.mxu1 %v1316_v49  ;;  %v363_v13 = vld [vmem:[%s1942_s6 + $0x78] sm:$0xff]  ;;  %v362_v14 = vld [vmem:[%s1942_s6 + $0x70] sm:$0xff]  ;;  %v365_v15 = vld [vmem:[%s1942_s6 + $0x88] sm:$0xff] }
  0xaf   : > { %1299 = vmatpush3.bf16.msra.mxu0 %v1298_v32  ;;  %1321 = vmatprep.subr.bf16.mxu1 %v1320_v56  ;;  %v364_v16 = vld [vmem:[%s1942_s6 + $0x80] sm:$0xff]  ;;  %v367_v17 = vld [vmem:[%s1942_s6 + $0x98] sm:$0xff]  ;;  %v366_v18 = vld [vmem:[%s1942_s6 + $0x90] sm:$0xff] }
  0xb0   : > { %1301 = vmatprep.subr.bf16.mxu0 %v1300_v33  ;;  %v369_v19 = vld [vmem:[%s1942_s6 + $0xa8] sm:$0xff]  ;;  %v368_v20 = vld [vmem:[%s1942_s6 + $0xa0] sm:$0xff]  ;;  %v371_v21 = vld [vmem:[%s1942_s6 + $0xb8] sm:$0xff] }
  0xb1   : > { %v370_v22 = vld [vmem:[%s1942_s6 + $0xb0] sm:$0xff]  ;;  %v373_v23 = vld [vmem:[%s1942_s6 + $0xc8] sm:$0xff]  ;;  %v372_v24 = vld [vmem:[%s1942_s6 + $0xc0] sm:$0xff] }
  0xb2   : > { %1323 = vmatpush3.bf16.msra.mxu1 %v1320_v56  ;;  %v375_v25 = vld [vmem:[%s1942_s6 + $0xd8] sm:$0xff]  ;;  %v374_v26 = vld [vmem:[%s1942_s6 + $0xd0] sm:$0xff]  ;;  %v377_v27 = vld [vmem:[%s1942_s6 + $0xe8] sm:$0xff] }
  0xb3   : > { %1303 = vmatpush3.bf16.msra.mxu0 %v1302_v38  ;;  %1325 = vmatprep.subr.bf16.mxu1 %v1324_v60  ;;  %v376_v28 = vld [vmem:[%s1942_s6 + $0xe0] sm:$0xff]  ;;  %v379_v29 = vld [vmem:[%s1942_s6 + $0xf8] sm:$0xff]  ;;  %v378_v30 = vld [vmem:[%s1942_s6 + $0xf0] sm:$0xff] }
  0xb4   : > { %1305 = vmatprep.subr.bf16.mxu0 %v1304_v41  ;;  %v714_v31 = vld [vmem:[#allocation9 + $0x50] sm:$0xff]  ;;  %v715_v32 = vld [vmem:[#allocation9 + $0x58] sm:$0xff]  ;;  %v716_v34 = vld [vmem:[#allocation9 + $0x60] sm:$0xff] }
  0xb5   : > { %v1332_v33 = vpack.c.bf16 %v715_v32, %v714_v31  ;;  %v717_v35 = vld [vmem:[#allocation9 + $0x68] sm:$0xff]  ;;  %v718_v37 = vld [vmem:[#allocation9 + $0x70] sm:$0xff]  ;;  %v719_v38 = vld [vmem:[#allocation9 + $0x78] sm:$0xff] }
  0xb6   : > { %1327 = vmatpush3.bf16.msra.mxu1 %v1324_v60  ;;  %v1336_v36 = vpack.c.bf16 %v717_v35, %v716_v34  ;;  %v1340_v39 = vpack.c.bf16 %v719_v38, %v718_v37  ;;  %v624_v40 = vld [vmem:[%s1955_s26] sm:$0xff]  ;;  %v625_v45 = vld [vmem:[%s1955_s26 + $0x8] sm:$0xff] }
  0xb7   : > { %1307 = vmatpush3.bf16.msra.mxu0 %v1306_v52  ;;  %1329 = vmatprep.subr.bf16.mxu1 %v1328_v1  ;;  %v640_v44 = vmul.f32 0.1, %v624_v40  ;;  %v641_v50 = vmul.f32 0.1, %v625_v45  ;;  %v626_v52 = vld [vmem:[%s1955_s26 + $0x10] sm:$0xff]  ;;  %v633_v37 = vld [vmem:[%s1955_s26 + $0x48] sm:$0xff] }
  0xb8   : > { %1309 = vmatprep.subr.bf16.mxu0 %v1308_v53  ;;  %v642_v58 = vmul.f32 0.1, %v626_v52  ;;  %v635_v52 = vld [vmem:[%s1955_s26 + $0x58] sm:$0xff] }
  0xba   : > { %1331 = vmatpush3.bf16.msra.mxu1 %v1328_v1 }
  0xbb   : > { %1311 = vmatpush3.bf16.msra.mxu0 %v1310_v59  ;;  %1333 = vmatprep.subr.bf16.mxu1 %v1332_v33  ;;  %v627_v59 = vld [vmem:[%s1955_s26 + $0x18] sm:$0xff] }
  0xbc   : > { %v643_v1 = vmul.f32 0.1, %v627_v59  ;;  %v651_v59 = vmul.f32 0.1, %v635_v52 }
  0xbe   : > { %477 = vmatmul.mubr.f32.vlgmr.msra.gmra.mrb[0].mxu0 %v348_v63  ;;  %1335 = vmatpush3.bf16.msra.mxu1 %v1332_v33 }
  0xbf   : > { %481 = vmatprep.mubr.f32.mxu0 %v351_v0  ;;  %1337 = vmatprep.subr.bf16.mxu1 %v1336_v36 }
  0xc2   : > { %482 = vmatmul.mubr.f32.gmra.mrb[2].mxu0 %v350_v2  ;;  %1339 = vmatpush3.bf16.msra.mxu1 %v1336_v36  ;;  %v628_v2 = vld [vmem:[%s1955_s26 + $0x20] sm:$0xff] }
  0xc3   : > { %486 = vmatprep.mubr.f32.mxu0 %v353_v3  ;;  %1341 = vmatprep.subr.bf16.mxu1 %v1340_v39 }
  0xc6   : > { %487 = vmatmul.mubr.f32.gmra.mrb[4].mxu0 %v352_v4  ;;  %1343 = vmatpush3.bf16.msra.mxu1 %v1340_v39 }
  0xc7   : > { %491 = vmatprep.mubr.f32.mxu0 %v355_v5 }
  0xca   : > { %492 = vmatmul.mubr.f32.gmra.mrb[6].mxu0 %v354_v6 }
  0xcb   : > { %496 = vmatprep.mubr.f32.mxu0 %v357_v7 }
  0xce   : > { %497 = vmatmul.mubr.f32.gmra.mrb[8].mxu0 %v356_v8  ;;  %v644_v8 = vmul.f32 0.1, %v628_v2 }
  0xcf   : > { %501 = vmatprep.mubr.f32.mxu0 %v359_v9  ;;  %v629_v9 = vld [vmem:[%s1955_s26 + $0x28] sm:$0xff] }
  0xd2   : > { %502 = vmatmul.mubr.f32.gmra.mrb[10].mxu0 %v358_v10 }
  0xd3   : > { %506 = vmatprep.mubr.f32.mxu0 %v361_v11 }
  0xd6   : > { %507 = vmatmul.mubr.f32.gmra.mrb[12].mxu0 %v360_v12 }
  0xd7   : > { %511 = vmatprep.mubr.f32.mxu0 %v363_v13 }
  0xda   : > { %512 = vmatmul.mubr.f32.gmra.mrb[14].mxu0 %v362_v14 }
  0xdb   : > { %516 = vmatprep.mubr.f32.mxu0 %v365_v15  ;;  %v645_v15 = vmul.f32 0.1, %v629_v9 }
  0xde   : > { %517 = vmatmul.mubr.f32.gmra.mrb[16].mxu0 %v364_v16  ;;  %v630_v16 = vld [vmem:[%s1955_s26 + $0x30] sm:$0xff] }
  0xdf   : > { %521 = vmatprep.mubr.f32.mxu0 %v367_v17 }
  0xe2   : > { %522 = vmatmul.mubr.f32.gmra.mrb[18].mxu0 %v366_v18 }
  0xe3   : > { %526 = vmatprep.mubr.f32.mxu0 %v369_v19 }
  0xe6   : > { %527 = vmatmul.mubr.f32.gmra.mrb[20].mxu0 %v368_v20 }
  0xe7   : > { %531 = vmatprep.mubr.f32.mxu0 %v371_v21 }
  0xea   : > { %532 = vmatmul.mubr.f32.gmra.mrb[22].mxu0 %v370_v22  ;;  %v646_v22 = vmul.f32 0.1, %v630_v16 }
  0xeb   : > { %536 = vmatprep.mubr.f32.mxu0 %v373_v23  ;;  %v631_v23 = vld [vmem:[%s1955_s26 + $0x38] sm:$0xff] }
  0xee   : > { %537 = vmatmul.mubr.f32.gmra.mrb[24].mxu0 %v372_v24 }
  0xef   : > { %541 = vmatprep.mubr.f32.mxu0 %v375_v25 }
  0xf2   : > { %542 = vmatmul.mubr.f32.gmra.mrb[26].mxu0 %v374_v26 }
  0xf3   : > { %546 = vmatprep.mubr.f32.mxu0 %v377_v27 }
  0xf6   : > { %547 = vmatmul.mubr.f32.gmra.mrb[28].mxu0 %v376_v28 }
  0xf7   : > { %551 = vmatprep.mubr.f32.mxu0 %v379_v29  ;;  %v647_v29 = vmul.f32 0.1, %v631_v23 }
  0xfa   : > { %552 = vmatmul.mubr.f32.gmra.mrb[30].mxu0 %v378_v30  ;;  %v632_v30 = vld [vmem:[%s1955_s26 + $0x40] sm:$0xff] }
  0xfb   : > { %v648_v36 = vmul.f32 0.1, %v632_v30 }
 0x191   : > { %v1144_v41 = vpop.f32.mrb[0].mxu0 }
 0x192   : > { %v1145_v42 = vpop.f32.mrb[1].mxu0 }
 0x193   : > { %v1146_v43 = vadd.f32 %v1145_v42, %v1144_v41 }
 0x195   : > { %v608_v46 = vmul.f32 0.9, %v1146_v43  ;;  %v1147_v47 = vpop.f32.mrb[2].mxu0  ;;  %v649_v43 = vmul.f32 0.1, %v633_v37 }
 0x196   : > { %v1148_v48 = vpop.f32.mrb[3].mxu0 }
 0x197   : > { %v1149_v49 = vadd.f32 %v1148_v48, %v1147_v47  ;;  %v1999_v51 = vadd.f32 %v640_v44, %v608_v46  ;;  %v634_v44 = vld [vmem:[%s1955_s26 + $0x50] sm:$0xff] }
 0x199   : > { %v609_v53 = vmul.f32 0.9, %v1149_v49  ;;  %v1150_v54 = vpop.f32.mrb[4].mxu0  ;;  %1256 = vmatprep.mubr.f32.mxu1 %v1999_v51 }
 0x19a   : > { %v1151_v55 = vpop.f32.mrb[5].mxu0 }
 0x19b   : > { %v2003_v56 = vadd.f32 %v641_v50, %v609_v53  ;;  %v1152_v57 = vadd.f32 %v1151_v55, %v1150_v54  ;;  %v650_v50 = vmul.f32 0.1, %v634_v44 }
 0x19d   : > { %v610_v60 = vmul.f32 0.9, %v1152_v57  ;;  %v1153_v61 = vpop.f32.mrb[6].mxu0  ;;  %1257 = vmatmul.mubr.f32.vlgmr.msra.gmra.mrb[0].mxu1 %v2003_v56 }
 0x19e   : > { %v1154_v62 = vpop.f32.mrb[7].mxu0 }
 0x19f   : > { %v2007_v63 = vadd.f32 %v642_v58, %v610_v60  ;;  %v1155_v0 = vadd.f32 %v1154_v62, %v1153_v61  ;;  %v636_v60 = vld [vmem:[%s1955_s26 + $0x60] sm:$0xff] }
 0x1a1   : > { %v611_v3 = vmul.f32 0.9, %v1155_v0  ;;  %v1156_v4 = vpop.f32.mrb[8].mxu0  ;;  %1259 = vmatprep.mubr.f32.mxu1 %v2007_v63 }
 0x1a2   : > { %v1157_v5 = vpop.f32.mrb[9].mxu0 }
 0x1a3   : > { %v2011_v6 = vadd.f32 %v643_v1, %v611_v3  ;;  %v1158_v7 = vadd.f32 %v1157_v5, %v1156_v4  ;;  %v652_v3 = vmul.f32 0.1, %v636_v60  ;;  %v637_v4 = vld [vmem:[%s1955_s26 + $0x68] sm:$0xff] }
 0x1a5   : > { %v612_v10 = vmul.f32 0.9, %v1158_v7  ;;  %v1159_v11 = vpop.f32.mrb[10].mxu0  ;;  %1260 = vmatmul.mubr.f32.gmra.mrb[2].mxu1 %v2011_v6 }
 0x1a6   : > { %v1160_v12 = vpop.f32.mrb[11].mxu0 }
 0x1a7   : > { %v2015_v13 = vadd.f32 %v644_v8, %v612_v10  ;;  %v1161_v14 = vadd.f32 %v1160_v12, %v1159_v11  ;;  %v653_v11 = vmul.f32 0.1, %v637_v4  ;;  %v638_v12 = vld [vmem:[%s1955_s26 + $0x70] sm:$0xff] }
 0x1a9   : > { %v613_v17 = vmul.f32 0.9, %v1161_v14  ;;  %v1162_v18 = vpop.f32.mrb[12].mxu0  ;;  %1262 = vmatprep.mubr.f32.mxu1 %v2015_v13 }
 0x1aa   : > { %v1163_v19 = vpop.f32.mrb[13].mxu0 }
 0x1ab   : > { %v2019_v20 = vadd.f32 %v645_v15, %v613_v17  ;;  %v1164_v21 = vadd.f32 %v1163_v19, %v1162_v18  ;;  %v654_v19 = vmul.f32 0.1, %v638_v12 }
 0x1ad   : > { %v614_v24 = vmul.f32 0.9, %v1164_v21  ;;  %v1165_v25 = vpop.f32.mrb[14].mxu0  ;;  %1263 = vmatmul.mubr.f32.gmra.mrb[4].mxu1 %v2019_v20  ;;  %v639_v21 = vld [vmem:[%s1955_s26 + $0x78] sm:$0xff]  ;;  %v886_v52 = vmul.f32 0.7768564, %v2019_v20 }
 0x1ae   : > { %v1166_v26 = vpop.f32.mrb[15].mxu0 }
 0x1af   : > { %v2023_v27 = vadd.f32 %v646_v22, %v614_v24  ;;  %v1167_v28 = vadd.f32 %v1166_v26, %v1165_v25 }
 0x1b1   : > { %v615_v31 = vmul.f32 0.9, %v1167_v28  ;;  %v1168_v32 = vpop.f32.mrb[16].mxu0  ;;  %1265 = vmatprep.mubr.f32.mxu1 %v2023_v27  ;;  %v655_v28 = vmul.f32 0.1, %v639_v21 }
 0x1b2   : > { %v1169_v33 = vpop.f32.mrb[17].mxu0 }
 0x1b3   : > { %v2027_v34 = vadd.f32 %v647_v29, %v615_v31  ;;  %v1170_v35 = vadd.f32 %v1169_v33, %v1168_v32  ;;  %v882_v33 = vmul.f32 0.7768564, %v2003_v56 }
 0x1b5   : > { %v616_v38 = vmul.f32 0.9, %v1170_v35  ;;  %v1171_v39 = vpop.f32.mrb[18].mxu0  ;;  %1266 = vmatmul.mubr.f32.gmra.mrb[6].mxu1 %v2027_v34 }
 0x1b6   : > { %v1172_v40 = vpop.f32.mrb[19].mxu0 }
 0x1b7   : > { %v2031_v41 = vadd.f32 %v648_v36, %v616_v38  ;;  %v1173_v42 = vadd.f32 %v1172_v40, %v1171_v39  ;;  %v881_v36 = vmul.f32 0.7768564, %v1999_v51 }
 0x1b9   : > { %v617_v45 = vmul.f32 0.9, %v1173_v42  ;;  %v1174_v46 = vpop.f32.mrb[20].mxu0  ;;  %1268 = vmatprep.mubr.f32.mxu1 %v2031_v41 }
 0x1ba   : > { %v1175_v47 = vpop.f32.mrb[21].mxu0 }
 0x1bb   : > { %v2035_v48 = vadd.f32 %v649_v43, %v617_v45  ;;  %v1176_v49 = vadd.f32 %v1175_v47, %v1174_v46  ;;  %v884_v43 = vmul.f32 0.7768564, %v2011_v6  ;;  %v883_v46 = vmul.f32 0.7768564, %v2007_v63 }
 0x1bd   : > { %v618_v53 = vmul.f32 0.9, %v1176_v49  ;;  %v1177_v54 = vpop.f32.mrb[22].mxu0  ;;  %1269 = vmatmul.mubr.f32.gmra.mrb[8].mxu1 %v2035_v48 }
 0x1be   : > { %v1178_v55 = vpop.f32.mrb[23].mxu0 }
 0x1bf   : > { %v2039_v57 = vadd.f32 %v650_v50, %v618_v53  ;;  %v1179_v58 = vadd.f32 %v1178_v55, %v1177_v54  ;;  %v885_v54 = vmul.f32 0.7768564, %v2015_v13 }
 0x1c1   : > { %v619_v61 = vmul.f32 0.9, %v1179_v58  ;;  %v1180_v62 = vpop.f32.mrb[24].mxu0  ;;  %1271 = vmatprep.mubr.f32.mxu1 %v2039_v57 }
 0x1c2   : > { %v1181_v0 = vpop.f32.mrb[25].mxu0 }
 0x1c3   : > { %v2043_v1 = vadd.f32 %v651_v59, %v619_v61  ;;  %v1182_v2 = vadd.f32 %v1181_v0, %v1180_v62  ;;  %v888_v0 = vmul.f32 0.7768564, %v2027_v34 }
 0x1c5   : > { %v620_v5 = vmul.f32 0.9, %v1182_v2  ;;  %v1183_v7 = vpop.f32.mrb[26].mxu0  ;;  %1272 = vmatmul.mubr.f32.gmra.mrb[10].mxu1 %v2043_v1 }
 0x1c6   : > { %v1184_v8 = vpop.f32.mrb[27].mxu0 }
 0x1c7   : > { %v2047_v9 = vadd.f32 %v652_v3, %v620_v5  ;;  %v1185_v10 = vadd.f32 %v1184_v8, %v1183_v7  ;;  %v887_v3 = vmul.f32 0.7768564, %v2023_v27 }
 0x1c9   : > { %v621_v14 = vmul.f32 0.9, %v1185_v10  ;;  %v1186_v15 = vpop.f32.mrb[28].mxu0  ;;  %1274 = vmatprep.mubr.f32.mxu1 %v2047_v9 }
 0x1ca   : > { %v1187_v16 = vpop.f32.mrb[29].mxu0 }
 0x1cb   : > { %v2051_v17 = vadd.f32 %v653_v11, %v621_v14  ;;  %v1188_v18 = vadd.f32 %v1187_v16, %v1186_v15  ;;  %v890_v11 = vmul.f32 0.7768564, %v2035_v48  ;;  %v889_v14 = vmul.f32 0.7768564, %v2031_v41 }
 0x1cd   : > { %v622_v22 = vmul.f32 0.9, %v1188_v18  ;;  %v1189_v23 = vpop.f32.mrb[30].mxu0  ;;  %1275 = vmatmul.mubr.f32.gmra.mrb[12].mxu1 %v2051_v17 }
 0x1ce   : > { %v1190_v24 = vpop.f32.mrb[31].mxu0 }
 0x1cf   : > { %v2055_v25 = vadd.f32 %v654_v19, %v622_v22  ;;  %v1191_v26 = vadd.f32 %v1190_v24, %v1189_v23  ;;  %v892_v22 = vmul.f32 0.7768564, %v2043_v1  ;;  %v891_v24 = vmul.f32 0.7768564, %v2039_v57 }
 0x1d1   : > { %v623_v29 = vmul.f32 0.9, %v1191_v26  ;;  %1277 = vmatprep.mubr.f32.mxu1 %v2055_v25 }
 0x1d3   : > { %v2058_v30 = vadd.f32 %v655_v28, %v623_v29 }
 0x1d5   : > { %1278 = vmatmul.mubr.f32.gmra.mrb[14].mxu1 %v2058_v30 }
 0x270   : > { %v1258_v31 = vpop.f32.mrb[0].mxu1 }
 0x271   : > { %v866_v32 = vmul.f32 0.22314355, %v1258_v31  ;;  %v786_v35 = vpop.f32.mrb[1].mxu1 }
 0x272   : > { %v865_v37 = vmul.f32 0.22314355, %v786_v35 }
 0x273   : > { %v898_v38 = vadd.f32 %v882_v33, %v866_v32  ;;  %v894_v33 = vmul.f32 0.7768564, %v2051_v17  ;;  %v896_v17 = vmul.f32 0.7768564, %v2058_v30 }
 0x274   : > { %v897_v39 = vadd.f32 %v881_v36, %v865_v37  ;;  %v893_v36 = vmul.f32 0.7768564, %v2047_v9  ;;  %v895_v9 = vmul.f32 0.7768564, %v2055_v25 }
 0x275   : > { %1438 = vtanh.f32 %v898_v38 }
 0x276   : > { %1440 = vtanh.f32 %v897_v39 }
 0x278   : > { %v1261_v40 = vpop.f32.mrb[2].mxu1 }
 0x279   : > { %v868_v42 = vmul.f32 0.22314355, %v1261_v40  ;;  %v796_v44 = vpop.f32.mrb[3].mxu1 }
 0x27a   : > { %v867_v45 = vmul.f32 0.22314355, %v796_v44 }
 0x27b   : > { %v900_v47 = vadd.f32 %v884_v43, %v868_v42 }
 0x27c   : > { %v899_v49 = vadd.f32 %v883_v46, %v867_v45 }
 0x27d   : > { %1442 = vtanh.f32 %v900_v47 }
 0x27e   : > { %1444 = vtanh.f32 %v899_v49 }
 0x27f   : > { %v1439_v56 = vpop.eup %1438 }
 0x280   : > { %v1441_v51 = vpop.eup %1440  ;;  %930 = vst [vmem:[%s2067_s21 + $0x8] sm:$0xff] %v1439_v56  ;;  %v1264_v50 = vpop.f32.mrb[4].mxu1 }
 0x281   : > { %929 = vst [vmem:[%s2067_s21] sm:$0xff] %v1441_v51  ;;  %v870_v6 = vmul.f32 0.22314355, %v1264_v50  ;;  %v806_v63 = vpop.f32.mrb[5].mxu1 }
 0x282   : > { %v869_v53 = vmul.f32 0.22314355, %v806_v63 }
 0x283   : > { %v902_v55 = vadd.f32 %v886_v52, %v870_v6 }
 0x284   : > { %v901_v58 = vadd.f32 %v885_v54, %v869_v53 }
 0x285   : > { %1446 = vtanh.f32 %v902_v55 }
 0x286   : > { %1448 = vtanh.f32 %v901_v58 }
 0x287   : > { %v1443_v59 = vpop.eup %1442 }
 0x288   : > { %v1445_v60 = vpop.eup %1444  ;;  %932 = vst [vmem:[%s2067_s21 + $0x18] sm:$0xff] %v1443_v59  ;;  %v1267_v61 = vpop.f32.mrb[6].mxu1 }
 0x289   : > { %931 = vst [vmem:[%s2067_s21 + $0x10] sm:$0xff] %v1445_v60  ;;  %v872_v62 = vmul.f32 0.22314355, %v1267_v61  ;;  %v816_v2 = vpop.f32.mrb[7].mxu1 }
 0x28a   : > { %v871_v20 = vmul.f32 0.22314355, %v816_v2 }
 0x28b   : > { %v904_v4 = vadd.f32 %v888_v0, %v872_v62 }
 0x28c   : > { %v903_v13 = vadd.f32 %v887_v3, %v871_v20 }
 0x28d   : > { %1450 = vtanh.f32 %v904_v4 }
 0x28e   : > { %1452 = vtanh.f32 %v903_v13 }
 0x28f   : > { %v1447_v5 = vpop.eup %1446 }
 0x290   : > { %v1449_v7 = vpop.eup %1448  ;;  %934 = vst [vmem:[%s2067_s21 + $0x28] sm:$0xff] %v1447_v5  ;;  %v1270_v8 = vpop.f32.mrb[8].mxu1 }
 0x291   : > { %933 = vst [vmem:[%s2067_s21 + $0x20] sm:$0xff] %v1449_v7  ;;  %v874_v10 = vmul.f32 0.22314355, %v1270_v8  ;;  %v826_v12 = vpop.f32.mrb[9].mxu1 }
 0x292   : > { %v873_v34 = vmul.f32 0.22314355, %v826_v12 }
 0x293   : > { %v906_v15 = vadd.f32 %v890_v11, %v874_v10 }
 0x294   : > { %v905_v27 = vadd.f32 %v889_v14, %v873_v34 }
 0x295   : > { %1454 = vtanh.f32 %v906_v15 }
 0x296   : > { %1456 = vtanh.f32 %v905_v27 }
 0x297   : > { %v1451_v16 = vpop.eup %1450 }
 0x298   : > { %v1453_v18 = vpop.eup %1452  ;;  %936 = vst [vmem:[%s2067_s21 + $0x38] sm:$0xff] %v1451_v16  ;;  %v1273_v19 = vpop.f32.mrb[10].mxu1 }
 0x299   : > { %935 = vst [vmem:[%s2067_s21 + $0x30] sm:$0xff] %v1453_v18  ;;  %v876_v21 = vmul.f32 0.22314355, %v1273_v19  ;;  %v836_v23 = vpop.f32.mrb[11].mxu1 }
 0x29a   : > { %v875_v48 = vmul.f32 0.22314355, %v836_v23 }
 0x29b   : > { %v908_v26 = vadd.f32 %v892_v22, %v876_v21 }
 0x29c   : > { %v907_v41 = vadd.f32 %v891_v24, %v875_v48 }
 0x29d   : > { %1458 = vtanh.f32 %v908_v26 }
 0x29e   : > { %1460 = vtanh.f32 %v907_v41 }
 0x29f   : > { %v1455_v28 = vpop.eup %1454 }
 0x2a0   : > { %v1457_v29 = vpop.eup %1456  ;;  %938 = vst [vmem:[%s2067_s21 + $0x48] sm:$0xff] %v1455_v28  ;;  %v1276_v31 = vpop.f32.mrb[12].mxu1 }
 0x2a1   : > { %937 = vst [vmem:[%s2067_s21 + $0x40] sm:$0xff] %v1457_v29  ;;  %v878_v32 = vmul.f32 0.22314355, %v1276_v31  ;;  %v846_v35 = vpop.f32.mrb[13].mxu1 }
 0x2a2   : > { %v877_v1 = vmul.f32 0.22314355, %v846_v35 }
 0x2a3   : > { %v910_v37 = vadd.f32 %v894_v33, %v878_v32 }
 0x2a4   : > { %v909_v57 = vadd.f32 %v893_v36, %v877_v1 }
 0x2a5   : > { %1462 = vtanh.f32 %v910_v37 }
 0x2a6   : > { %1464 = vtanh.f32 %v909_v57 }
 0x2a7   : > { %v1459_v38 = vpop.eup %1458 }
 0x2a8   : > { %v1461_v39 = vpop.eup %1460  ;;  %940 = vst [vmem:[%s2067_s21 + $0x58] sm:$0xff] %v1459_v38  ;;  %v1279_v40 = vpop.f32.mrb[14].mxu1 }
 0x2a9   : > { %939 = vst [vmem:[%s2067_s21 + $0x50] sm:$0xff] %v1461_v39  ;;  %v880_v42 = vmul.f32 0.22314355, %v1279_v40  ;;  %v856_v43 = vpop.f32.mrb[15].mxu1 }
 0x2aa   : > { %v879_v44 = vmul.f32 0.22314355, %v856_v43 }
 0x2ab   : > { %v912_v45 = vadd.f32 %v896_v17, %v880_v42 }
 0x2ac   : > { %v911_v46 = vadd.f32 %v895_v9, %v879_v44 }
 0x2ad   : > { %1466 = vtanh.f32 %v912_v45 }
 0x2ae   : > { %1468 = vtanh.f32 %v911_v46 }
 0x2af   : > { %v1463_v47 = vpop.eup %1462 }
 0x2b0   : > { %v1465_v49 = vpop.eup %1464  ;;  %942 = vst [vmem:[%s2067_s21 + $0x68] sm:$0xff] %v1463_v47 }
 0x2b1   : > { %941 = vst [vmem:[%s2067_s21 + $0x60] sm:$0xff] %v1465_v49 }
 0x2b7   : > { %v1467_v25 = vpop.eup %1466 }
 0x2b8   : > { %v1469_v30 = vpop.eup %1468  ;;  %944 = vst [vmem:[%s2067_s21 + $0x78] sm:$0xff] %v1467_v25 }
 0x2b9   : > { %943 = vst [vmem:[%s2067_s21 + $0x70] sm:$0xff] %v1469_v30 }
 0x2ba   : > { %1599 = shalt.err (!%p1596_p12)
}
 0x2bb   : > { %s1600_s1 = scalar_lea.hbm %s2100_s12, 2048  ;;  %s1604_s11 = scalar_lea.hbm %s2157_s4, 4096 }
 0x2bc   : > { %p1601_p8 = scmp.ne.s32.totalorder %s2100_s12, %s1600_s1  ;;  %p1605_p5 = scmp.lt.u32.totalorder %s2100_s12, %s2157_s4 }
 0x2bd   : > { %p1606_p9 = scmp.lt.u32.totalorder %s1604_s11, %s1600_s1  ;;  %p1608_p4 = scmp.lt.u32.totalorder %s1600_s1, %s2100_s12 }
 0x2be   : > { %p1602_p0 = pnand %p1601_p8, %p2201_p6 }
 0x2bf   : > { %p1607_p2 = por %p1606_p9, %p1605_p5 }
 0x2c0   : > { %p1603_p7 = pneg %p1602_p0 }
 0x2c1   : > { %p1609_p10 = por %p1608_p4, %p1607_p2 }
 0x2c3   : > { %p1610_p3 = pnand %p1609_p10, %p1603_p7 }
 0x2c5   : > { %1613 = shalt.err (!%p1610_p3)
}
 0x2c6   : > { %s1691_s27 = smov 128   ;;  %s1692_s6 = smov 8  }
 0x2c7   : > { %1356 = dma.vmem_to_hbm [thread:$0]  (%p2201_p6), %s2102_s30, 2048, %s2100_s12, %s946_s0, %s1691_s27, %s1691_s27, %s1692_s6  }
 0x2c8 PF: > { %s2202_s25 = sld [smem:[#allocation16_spill]]  ;;  %s974_s26 = sand.u32 1, %s1660_s15  }
 0x2c9   : > { %p2203_p13 = scmp.ne.s32.totalorder %s2177_s24, 0  ;;  %s975_s21 = scalar_lea.sflag [#allocation5], %s974_s26 }
 0x2ce   : > { %p2204_p1 = scmp.ge.s32.totalorder %s2202_s25, 2 }
 0x2d0   : > { %p1373_p11 = pnand %p2204_p1, %p2203_p13 }
 0x2d2   : > { %1655 = dma.done.wait (!%p1373_p11), %s975_s21, 2048  }
 0x2d3   : > { %1657 = vsyncadd (!%p1373_p11), %s975_s21, 4294965248  ;;  %s21_s20 = sadd.s32 1, %s2202_s25   ;;  %s2205_s23 = sld [smem:[#allocation18_spill]] }
 0x2d4   : > { %p18_p12 = scmp.ge.s32.totalorder %s21_s20, 4   ;;  %s2206_s5 = sld [smem:[#allocation17_spill]] }
 0x2d5   : > { %s2207_s15 = smov %s1664_s16  ;;  %s2208_s16 = smov %s1668_s17 }
 0x2d6   : > { %s2210_s18 = smov %s1676_s19  ;;  %20 = sbr.rel (!%p18_p12) target bundleno = 10 (0xa), region = 109 }
 0x2d9   : > { %s2209_s17 = smov %s2205_s23 }
 0x2da   : > { %s2211_s19 = smov %s2206_s5 }
 0x2dd   :  { %980 = vsyncpa [#allocation4], 1 }
 0x2de   :  { %982 = vsyncpa [#allocation4 + $0x1], 1 }
 0x2df   :  { %983 = vsyncpa [#allocation7], 1 }
 0x2e0   :  { %984 = vsyncpa [#allocation5], 1 }
 0x2e1   :  { %986 = vsyncpa [#allocation5 + $0x1], 1 }

</bundles_post_ra>
